<compile_context>
chip_gen: v5e
topology: v5e:2x2
jax: 0.10.0
libtpu: 0.0.40
codegen_flags: <defaults>
</compile_context>

<pallas_src>
import functools

import jax
import jax.numpy as jnp
from jax.experimental import pallas as pl
from jax.experimental.pallas import tpu as pltpu


def _aux_kernel(x_ref, wih_ref, whh_ref, b_ref, wlin_ref, blin_ref, noise_ref,
                out_ref, xw_ref, hh_ref, *, tau, is_train, b_pad):
    """LSTM recurrence + vectorized gate head.

    x_ref:     [T*Bp, E]   time-major input, batch padded to Bp, flattened
    wih_ref:   [E, 4H]     W_ih^T (PyTorch gate order i, f, g, o)
    whh_ref:   [H, 4H]     W_hh^T
    b_ref:     [1, 4H]     b_ih + b_hh  (added exactly once, in the hoisted proj)
    wlin_ref:  [1, H]      aux_linear.weight
    blin_ref:  [1, 1]      aux_linear.bias                    (SMEM scalar)
    noise_ref: [1, T*Bp]   train: gumbel1 - gumbel0 ; eval: uniform(0,1)
    out_ref:   [1, T*Bp]   g_t, flat index t*Bp + b
    xw_ref:    [T*Bp, 4H]  VMEM scratch: hoisted input projection
    hh_ref:    [T*Bp, H]   VMEM scratch: hidden-state history
    """
    tb, four_h = xw_ref.shape
    h_dim = hh_ref.shape[1]
    n_t = tb // b_pad

    # ---- (1) hoisted input projection: one MXU matmul for all timesteps ----
    xw_ref[...] = (
        jnp.dot(x_ref[...], wih_ref[...], preferred_element_type=jnp.float32)
        + b_ref[...])

    # ---- (2) serial recurrence: only h @ W_hh^T remains per step -----------
    whh = whh_ref[...]                                        # loop-invariant load
    lane = jax.lax.broadcasted_iota(jnp.int32, (b_pad, four_h), 1)
    is_cell_gate = (lane >= 2 * h_dim) & (lane < 3 * h_dim)   # hoisted lane mask

    def step(t, carry):
        h, c = carry
        row = pl.multiple_of(t * b_pad, b_pad)
        gates = xw_ref[pl.ds(row, b_pad), :] + jnp.dot(
            h, whh, preferred_element_type=jnp.float32)       # [Bp, 4H]
        # i/f/o -> sigmoid, g -> tanh, selected by a lane mask on one vreg.
        act = jnp.where(is_cell_gate, jnp.tanh(gates), jax.nn.sigmoid(gates))
        i_g = act[:, 0 * h_dim:1 * h_dim]
        f_g = act[:, 1 * h_dim:2 * h_dim]
        g_g = act[:, 2 * h_dim:3 * h_dim]
        o_g = act[:, 3 * h_dim:4 * h_dim]
        c_new = f_g * c + i_g * g_g
        h_new = o_g * jnp.tanh(c_new)
        hh_ref[pl.ds(row, b_pad), :] = h_new
        return h_new, c_new

    h0 = jnp.zeros((b_pad, h_dim), jnp.float32)
    c0 = jnp.zeros((b_pad, h_dim), jnp.float32)
    jax.lax.fori_loop(0, n_t, step, (h0, c0), unroll=True)    # short static loop

    # ---- (3) vectorized gate head over all timesteps (out of the loop) -----
    hh = hh_ref[...]                                          # [T*Bp, H]
    logit = jax.lax.dot_general(                              # [1, H] x [T*Bp, H]^T
        wlin_ref[...], hh, (((1,), (1,)), ((), ())),
        preferred_element_type=jnp.float32)                   # -> [1, T*Bp]
    p = jax.nn.sigmoid(logit + blin_ref[0, 0])                # p_t in (0,1)

    noise = noise_ref[...]                                    # [1, T*Bp]
    if is_train:
        # F.gumbel_softmax over the 2 "logits" [1-p, p] with temperature tau;
        # softmax over 2 classes == sigmoid of the noisy logit difference.
        g = jax.nn.sigmoid(((2.0 * p - 1.0) + noise) / tau)
    else:
        # Bernoulli(p) sample via inverse-CDF on uniform noise.
        g = (noise < p).astype(jnp.float32)

    out_ref[...] = g                                          # single dense store


def init_params(key, embedding_length, hidden_size):
    """Deterministic parameter init matching the PyTorch module's shapes."""
    E, H = embedding_length, hidden_size
    k = jax.random.split(key, 6)
    bound = 1.0 / jnp.sqrt(jnp.float32(H))
    u = lambda kk, shape: jax.random.uniform(kk, shape, jnp.float32,
                                             minval=-bound, maxval=bound)
    wih_t = u(k[0], (E, 4 * H))                     # W_ih^T (PyTorch: [4H, E])
    whh_t = u(k[1], (H, 4 * H))                     # W_hh^T (PyTorch: [4H, H])
    b = u(k[2], (1, 4 * H)) + u(k[3], (1, 4 * H))   # b_ih + b_hh
    wlin = u(k[4], (1, H))                          # aux_linear.weight
    blin = u(k[5], (1, 1))                          # aux_linear.bias
    return wih_t, whh_t, b, wlin, blin


def auxiliary_net_forward(x, params, noise_key, *, tau=1.0, is_train=True):
    """x: [B, T, E] (batch_first, as in the PyTorch module). Returns g_t: [B, T]."""
    B, T, E = x.shape
    wih_t, whh_t, b, wlin, blin = params
    H = whh_t.shape[0]

    b_pad = max(8, ((B + 7) // 8) * 8)              # pad batch to f32 sublane count
    tb = T * b_pad

    # time-major, zero-pad the batch, flatten -> [T*Bp, E]
    x_tm = jnp.transpose(x, (1, 0, 2)).astype(jnp.float32)        # [T, B, E]
    x_tm = jnp.pad(x_tm, ((0, 0), (0, b_pad - B), (0, 0)))
    x_flat = x_tm.reshape(tb, E)

    # noise precomputed (and pre-transformed) outside the serial recurrence
    if is_train:
        gmb = jax.random.gumbel(noise_key, (2, T, b_pad), jnp.float32)
        noise = (gmb[1] - gmb[0]).reshape(1, tb)                  # g1 - g0
    else:
        noise = jax.random.uniform(noise_key, (T, b_pad), jnp.float32,
                                   minval=1e-6, maxval=1.0 - 1e-6).reshape(1, tb)

    kernel = functools.partial(_aux_kernel, tau=float(tau),
                               is_train=bool(is_train), b_pad=b_pad)

    vmem = pltpu.MemorySpace.VMEM
    out = pl.pallas_call(
        kernel,
        out_shape=jax.ShapeDtypeStruct((1, tb), jnp.float32),
        in_specs=[
            pl.BlockSpec(memory_space=vmem),                      # x
            pl.BlockSpec(memory_space=vmem),                      # W_ih^T
            pl.BlockSpec(memory_space=vmem),                      # W_hh^T
            pl.BlockSpec(memory_space=vmem),                      # bias
            pl.BlockSpec(memory_space=vmem),                      # aux_linear.weight
            pl.BlockSpec(memory_space=pltpu.MemorySpace.SMEM),    # aux_linear.bias
            pl.BlockSpec(memory_space=vmem),                      # noise
        ],
        out_specs=pl.BlockSpec(memory_space=vmem),
        scratch_shapes=[
            pltpu.VMEM((tb, 4 * H), jnp.float32),   # hoisted input projection
            pltpu.VMEM((tb, H), jnp.float32),       # hidden-state history
        ],
    )(x_flat, wih_t, whh_t, b, wlin, blin, noise)

    g = out.reshape(T, b_pad)[:, :B]                              # [T, B]
    return jnp.transpose(g, (1, 0))                               # [B, T]


if __name__ == "__main__":
    B, T, E, H = 2, 8, 32, 32    # batch, seq len, embedding_length, aux_hidden_size
    root = jax.random.PRNGKey(0)
    k_param, k_x, k_noise = jax.random.split(root, 3)

    params = init_params(k_param, E, H)
    x = jax.random.normal(k_x, (B, T, E), jnp.float32)

    g_train = auxiliary_net_forward(x, params, k_noise, tau=1.0, is_train=True)
    g_eval = auxiliary_net_forward(x, params, k_noise, tau=1.0, is_train=False)
    jax.block_until_ready(g_train)
    jax.block_until_ready(g_eval)

    assert g_train.shape == (B, T) and g_eval.shape == (B, T)
    assert bool(jnp.all(jnp.isfinite(g_train)))
    assert bool(jnp.all((g_train >= 0.0) & (g_train <= 1.0)))
    assert bool(jnp.all((g_eval == 0.0) | (g_eval == 1.0)))
    print("KERNEL_OK")
</pallas_src>

<mosaic_0001>
module attributes {stable_mosaic.version = 11 : i64} {
  func.func @_aux_kernel(%arg0: memref<64x32xf32, #tpu.memory_space<vmem>>, %arg1: memref<32x128xf32, #tpu.memory_space<vmem>>, %arg2: memref<32x128xf32, #tpu.memory_space<vmem>>, %arg3: memref<1x128xf32, #tpu.memory_space<vmem>>, %arg4: memref<1x32xf32, #tpu.memory_space<vmem>>, %arg5: memref<1x1xf32, #tpu.memory_space<smem>>, %arg6: memref<1x64xf32, #tpu.memory_space<vmem>>, %arg7: memref<1x64xf32, #tpu.memory_space<vmem>>, %arg8: memref<64x128xf32, #tpu.memory_space<vmem>>, %arg9: memref<64x32xf32, #tpu.memory_space<vmem>>) attributes {dimension_semantics = [], scalar_prefetch = 0 : i64, scratch_operands = 2 : i64, tpu.core_type = #tpu.core_type<tc>} {
    %c0 = arith.constant 0 : index
    %c0_0 = arith.constant 0 : index
    %0 = vector.load %arg0[%c0, %c0_0] : memref<64x32xf32, #tpu.memory_space<vmem>>, vector<64x32xf32>
    %c0_1 = arith.constant 0 : index
    %c0_2 = arith.constant 0 : index
    %1 = vector.load %arg1[%c0_1, %c0_2] : memref<32x128xf32, #tpu.memory_space<vmem>>, vector<32x128xf32>
    %cst = arith.constant dense<0.000000e+00> : vector<64x128xf32>
    %2 = tpu.matmul %0, %1, %cst {dimension_numbers = #tpu.dot_dimension_numbers<[1], [0], [0], [1], [0, 0, 1, 1], [], []>} : vector<64x32xf32>, vector<32x128xf32>, vector<64x128xf32> -> vector<64x128xf32>
    %c0_3 = arith.constant 0 : index
    %c0_4 = arith.constant 0 : index
    %3 = vector.load %arg3[%c0_3, %c0_4] : memref<1x128xf32, #tpu.memory_space<vmem>>, vector<1x128xf32>
    %4 = vector.broadcast %3 : vector<1x128xf32> to vector<64x128xf32>
    %5 = arith.addf %2, %4 : vector<64x128xf32>
    %c0_5 = arith.constant 0 : index
    %c0_6 = arith.constant 0 : index
    %6 = vector.load %arg8[%c0_5, %c0_6] : memref<64x128xf32, #tpu.memory_space<vmem>>, vector<64x128xf32>
    tpu.vector_store %arg8[%c0_5, %c0_6], %5 {strides = array<i32>} : memref<64x128xf32, #tpu.memory_space<vmem>>, vector<64x128xf32>,
    %c0_7 = arith.constant 0 : index
    %c0_8 = arith.constant 0 : index
    %7 = vector.load %arg2[%c0_7, %c0_8] : memref<32x128xf32, #tpu.memory_space<vmem>>, vector<32x128xf32>
    %8 = tpu.iota {dimensions = array<i32: 1>} : vector<8x128xi32>
    %c64_i32 = arith.constant 64 : i32
    %9 = vector.broadcast %c64_i32 : i32 to vector<8x128xi32>
    %10 = arith.cmpi sge, %8, %9 : vector<8x128xi32>
    %c96_i32 = arith.constant 96 : i32
    %11 = vector.broadcast %c96_i32 : i32 to vector<8x128xi32>
    %12 = arith.cmpi slt, %8, %11 : vector<8x128xi32>
    %13 = arith.andi %10, %12 : vector<8x128xi1>
    %cst_9 = arith.constant 0.000000e+00 : f32
    %14 = vector.broadcast %cst_9 : f32 to vector<8x32xf32>
    %cst_10 = arith.constant 0.000000e+00 : f32
    %15 = vector.broadcast %cst_10 : f32 to vector<8x32xf32>
    %c0_i32 = arith.constant 0 : i32
    %c8_i32 = arith.constant 8 : i32
    %16 = arith.muli %c0_i32, %c8_i32 : i32
    %17 = tpu.assume_multiple %16, 8 : i32
    %18 = arith.index_cast %17 : i32 to index
    %c0_11 = arith.constant 0 : index
    %19 = vector.load %arg8[%18, %c0_11] : memref<64x128xf32, #tpu.memory_space<vmem>>, vector<8x128xf32>
    %cst_12 = arith.constant dense<0.000000e+00> : vector<8x128xf32>
    %20 = tpu.matmul %14, %7, %cst_12 {dimension_numbers = #tpu.dot_dimension_numbers<[1], [0], [0], [1], [0, 0, 1, 1], [], []>} : vector<8x32xf32>, vector<32x128xf32>, vector<8x128xf32> -> vector<8x128xf32>
    %21 = arith.addf %19, %20 : vector<8x128xf32>
    %22 = math.tanh %21 : vector<8x128xf32>
    %23 = arith.negf %21 : vector<8x128xf32>
    %24 = math.exp %23 : vector<8x128xf32>
    %cst_13 = arith.constant 1.000000e+00 : f32
    %25 = vector.broadcast %cst_13 : f32 to vector<8x128xf32>
    %26 = arith.addf %25, %24 : vector<8x128xf32>
    %27 = arith.divf %25, %26 : vector<8x128xf32>
    %28 = arith.select %13, %22, %27 : vector<8x128xi1>, vector<8x128xf32>
    %29 = vector.extract_strided_slice %28 {offsets = [0, 0], sizes = [8, 32], strides = [1, 1]} : vector<8x128xf32> to vector<8x32xf32>
    %30 = vector.extract_strided_slice %28 {offsets = [0, 32], sizes = [8, 32], strides = [1, 1]} : vector<8x128xf32> to vector<8x32xf32>
    %31 = vector.extract_strided_slice %28 {offsets = [0, 64], sizes = [8, 32], strides = [1, 1]} : vector<8x128xf32> to vector<8x32xf32>
    %32 = vector.extract_strided_slice %28 {offsets = [0, 96], sizes = [8, 32], strides = [1, 1]} : vector<8x128xf32> to vector<8x32xf32>
    %33 = arith.mulf %30, %15 : vector<8x32xf32>
    %34 = arith.mulf %29, %31 : vector<8x32xf32>
    %35 = arith.addf %33, %34 : vector<8x32xf32>
    %36 = math.tanh %35 : vector<8x32xf32>
    %37 = arith.mulf %32, %36 : vector<8x32xf32>
    %38 = arith.index_cast %17 : i32 to index
    %c0_14 = arith.constant 0 : index
    %39 = vector.load %arg9[%38, %c0_14] : memref<64x32xf32, #tpu.memory_space<vmem>>, vector<8x32xf32>
    tpu.vector_store %arg9[%38, %c0_14], %37 {strides = array<i32>} : memref<64x32xf32, #tpu.memory_space<vmem>>, vector<8x32xf32>,
    %c1_i32 = arith.constant 1 : i32
    %c8_i32_15 = arith.constant 8 : i32
    %40 = arith.muli %c1_i32, %c8_i32_15 : i32
    %41 = tpu.assume_multiple %40, 8 : i32
    %42 = arith.index_cast %41 : i32 to index
    %c0_16 = arith.constant 0 : index
    %43 = vector.load %arg8[%42, %c0_16] : memref<64x128xf32, #tpu.memory_space<vmem>>, vector<8x128xf32>
    %cst_17 = arith.constant dense<0.000000e+00> : vector<8x128xf32>
    %44 = tpu.matmul %37, %7, %cst_17 {dimension_numbers = #tpu.dot_dimension_numbers<[1], [0], [0], [1], [0, 0, 1, 1], [], []>} : vector<8x32xf32>, vector<32x128xf32>, vector<8x128xf32> -> vector<8x128xf32>
    %45 = arith.addf %43, %44 : vector<8x128xf32>
    %46 = math.tanh %45 : vector<8x128xf32>
    %47 = arith.negf %45 : vector<8x128xf32>
    %48 = math.exp %47 : vector<8x128xf32>
    %cst_18 = arith.constant 1.000000e+00 : f32
    %49 = vector.broadcast %cst_18 : f32 to vector<8x128xf32>
    %50 = arith.addf %49, %48 : vector<8x128xf32>
    %51 = arith.divf %49, %50 : vector<8x128xf32>
    %52 = arith.select %13, %46, %51 : vector<8x128xi1>, vector<8x128xf32>
    %53 = vector.extract_strided_slice %52 {offsets = [0, 0], sizes = [8, 32], strides = [1, 1]} : vector<8x128xf32> to vector<8x32xf32>
    %54 = vector.extract_strided_slice %52 {offsets = [0, 32], sizes = [8, 32], strides = [1, 1]} : vector<8x128xf32> to vector<8x32xf32>
    %55 = vector.extract_strided_slice %52 {offsets = [0, 64], sizes = [8, 32], strides = [1, 1]} : vector<8x128xf32> to vector<8x32xf32>
    %56 = vector.extract_strided_slice %52 {offsets = [0, 96], sizes = [8, 32], strides = [1, 1]} : vector<8x128xf32> to vector<8x32xf32>
    %57 = arith.mulf %54, %35 : vector<8x32xf32>
    %58 = arith.mulf %53, %55 : vector<8x32xf32>
    %59 = arith.addf %57, %58 : vector<8x32xf32>
    %60 = math.tanh %59 : vector<8x32xf32>
    %61 = arith.mulf %56, %60 : vector<8x32xf32>
    %62 = arith.index_cast %41 : i32 to index
    %c0_19 = arith.constant 0 : index
    %63 = vector.load %arg9[%62, %c0_19] : memref<64x32xf32, #tpu.memory_space<vmem>>, vector<8x32xf32>
    tpu.vector_store %arg9[%62, %c0_19], %61 {strides = array<i32>} : memref<64x32xf32, #tpu.memory_space<vmem>>, vector<8x32xf32>,
    %c2_i32 = arith.constant 2 : i32
    %c8_i32_20 = arith.constant 8 : i32
    %64 = arith.muli %c2_i32, %c8_i32_20 : i32
    %65 = tpu.assume_multiple %64, 8 : i32
    %66 = arith.index_cast %65 : i32 to index
    %c0_21 = arith.constant 0 : index
    %67 = vector.load %arg8[%66, %c0_21] : memref<64x128xf32, #tpu.memory_space<vmem>>, vector<8x128xf32>
    %cst_22 = arith.constant dense<0.000000e+00> : vector<8x128xf32>
    %68 = tpu.matmul %61, %7, %cst_22 {dimension_numbers = #tpu.dot_dimension_numbers<[1], [0], [0], [1], [0, 0, 1, 1], [], []>} : vector<8x32xf32>, vector<32x128xf32>, vector<8x128xf32> -> vector<8x128xf32>
    %69 = arith.addf %67, %68 : vector<8x128xf32>
    %70 = math.tanh %69 : vector<8x128xf32>
    %71 = arith.negf %69 : vector<8x128xf32>
    %72 = math.exp %71 : vector<8x128xf32>
    %cst_23 = arith.constant 1.000000e+00 : f32
    %73 = vector.broadcast %cst_23 : f32 to vector<8x128xf32>
    %74 = arith.addf %73, %72 : vector<8x128xf32>
    %75 = arith.divf %73, %74 : vector<8x128xf32>
    %76 = arith.select %13, %70, %75 : vector<8x128xi1>, vector<8x128xf32>
    %77 = vector.extract_strided_slice %76 {offsets = [0, 0], sizes = [8, 32], strides = [1, 1]} : vector<8x128xf32> to vector<8x32xf32>
    %78 = vector.extract_strided_slice %76 {offsets = [0, 32], sizes = [8, 32], strides = [1, 1]} : vector<8x128xf32> to vector<8x32xf32>
    %79 = vector.extract_strided_slice %76 {offsets = [0, 64], sizes = [8, 32], strides = [1, 1]} : vector<8x128xf32> to vector<8x32xf32>
    %80 = vector.extract_strided_slice %76 {offsets = [0, 96], sizes = [8, 32], strides = [1, 1]} : vector<8x128xf32> to vector<8x32xf32>
    %81 = arith.mulf %78, %59 : vector<8x32xf32>
    %82 = arith.mulf %77, %79 : vector<8x32xf32>
    %83 = arith.addf %81, %82 : vector<8x32xf32>
    %84 = math.tanh %83 : vector<8x32xf32>
    %85 = arith.mulf %80, %84 : vector<8x32xf32>
    %86 = arith.index_cast %65 : i32 to index
    %c0_24 = arith.constant 0 : index
    %87 = vector.load %arg9[%86, %c0_24] : memref<64x32xf32, #tpu.memory_space<vmem>>, vector<8x32xf32>
    tpu.vector_store %arg9[%86, %c0_24], %85 {strides = array<i32>} : memref<64x32xf32, #tpu.memory_space<vmem>>, vector<8x32xf32>,
    %c3_i32 = arith.constant 3 : i32
    %c8_i32_25 = arith.constant 8 : i32
    %88 = arith.muli %c3_i32, %c8_i32_25 : i32
    %89 = tpu.assume_multiple %88, 8 : i32
    %90 = arith.index_cast %89 : i32 to index
    %c0_26 = arith.constant 0 : index
    %91 = vector.load %arg8[%90, %c0_26] : memref<64x128xf32, #tpu.memory_space<vmem>>, vector<8x128xf32>
    %cst_27 = arith.constant dense<0.000000e+00> : vector<8x128xf32>
    %92 = tpu.matmul %85, %7, %cst_27 {dimension_numbers = #tpu.dot_dimension_numbers<[1], [0], [0], [1], [0, 0, 1, 1], [], []>} : vector<8x32xf32>, vector<32x128xf32>, vector<8x128xf32> -> vector<8x128xf32>
    %93 = arith.addf %91, %92 : vector<8x128xf32>
    %94 = math.tanh %93 : vector<8x128xf32>
    %95 = arith.negf %93 : vector<8x128xf32>
    %96 = math.exp %95 : vector<8x128xf32>
    %cst_28 = arith.constant 1.000000e+00 : f32
    %97 = vector.broadcast %cst_28 : f32 to vector<8x128xf32>
    %98 = arith.addf %97, %96 : vector<8x128xf32>
    %99 = arith.divf %97, %98 : vector<8x128xf32>
    %100 = arith.select %13, %94, %99 : vector<8x128xi1>, vector<8x128xf32>
    %101 = vector.extract_strided_slice %100 {offsets = [0, 0], sizes = [8, 32], strides = [1, 1]} : vector<8x128xf32> to vector<8x32xf32>
    %102 = vector.extract_strided_slice %100 {offsets = [0, 32], sizes = [8, 32], strides = [1, 1]} : vector<8x128xf32> to vector<8x32xf32>
    %103 = vector.extract_strided_slice %100 {offsets = [0, 64], sizes = [8, 32], strides = [1, 1]} : vector<8x128xf32> to vector<8x32xf32>
    %104 = vector.extract_strided_slice %100 {offsets = [0, 96], sizes = [8, 32], strides = [1, 1]} : vector<8x128xf32> to vector<8x32xf32>
    %105 = arith.mulf %102, %83 : vector<8x32xf32>
    %106 = arith.mulf %101, %103 : vector<8x32xf32>
    %107 = arith.addf %105, %106 : vector<8x32xf32>
    %108 = math.tanh %107 : vector<8x32xf32>
    %109 = arith.mulf %104, %108 : vector<8x32xf32>
    %110 = arith.index_cast %89 : i32 to index
    %c0_29 = arith.constant 0 : index
    %111 = vector.load %arg9[%110, %c0_29] : memref<64x32xf32, #tpu.memory_space<vmem>>, vector<8x32xf32>
    tpu.vector_store %arg9[%110, %c0_29], %109 {strides = array<i32>} : memref<64x32xf32, #tpu.memory_space<vmem>>, vector<8x32xf32>,
    %c4_i32 = arith.constant 4 : i32
    %c8_i32_30 = arith.constant 8 : i32
    %112 = arith.muli %c4_i32, %c8_i32_30 : i32
    %113 = tpu.assume_multiple %112, 8 : i32
    %114 = arith.index_cast %113 : i32 to index
    %c0_31 = arith.constant 0 : index
    %115 = vector.load %arg8[%114, %c0_31] : memref<64x128xf32, #tpu.memory_space<vmem>>, vector<8x128xf32>
    %cst_32 = arith.constant dense<0.000000e+00> : vector<8x128xf32>
    %116 = tpu.matmul %109, %7, %cst_32 {dimension_numbers = #tpu.dot_dimension_numbers<[1], [0], [0], [1], [0, 0, 1, 1], [], []>} : vector<8x32xf32>, vector<32x128xf32>, vector<8x128xf32> -> vector<8x128xf32>
    %117 = arith.addf %115, %116 : vector<8x128xf32>
    %118 = math.tanh %117 : vector<8x128xf32>
    %119 = arith.negf %117 : vector<8x128xf32>
    %120 = math.exp %119 : vector<8x128xf32>
    %cst_33 = arith.constant 1.000000e+00 : f32
    %121 = vector.broadcast %cst_33 : f32 to vector<8x128xf32>
    %122 = arith.addf %121, %120 : vector<8x128xf32>
    %123 = arith.divf %121, %122 : vector<8x128xf32>
    %124 = arith.select %13, %118, %123 : vector<8x128xi1>, vector<8x128xf32>
    %125 = vector.extract_strided_slice %124 {offsets = [0, 0], sizes = [8, 32], strides = [1, 1]} : vector<8x128xf32> to vector<8x32xf32>
    %126 = vector.extract_strided_slice %124 {offsets = [0, 32], sizes = [8, 32], strides = [1, 1]} : vector<8x128xf32> to vector<8x32xf32>
    %127 = vector.extract_strided_slice %124 {offsets = [0, 64], sizes = [8, 32], strides = [1, 1]} : vector<8x128xf32> to vector<8x32xf32>
    %128 = vector.extract_strided_slice %124 {offsets = [0, 96], sizes = [8, 32], strides = [1, 1]} : vector<8x128xf32> to vector<8x32xf32>
    %129 = arith.mulf %126, %107 : vector<8x32xf32>
    %130 = arith.mulf %125, %127 : vector<8x32xf32>
    %131 = arith.addf %129, %130 : vector<8x32xf32>
    %132 = math.tanh %131 : vector<8x32xf32>
    %133 = arith.mulf %128, %132 : vector<8x32xf32>
    %134 = arith.index_cast %113 : i32 to index
    %c0_34 = arith.constant 0 : index
    %135 = vector.load %arg9[%134, %c0_34] : memref<64x32xf32, #tpu.memory_space<vmem>>, vector<8x32xf32>
    tpu.vector_store %arg9[%134, %c0_34], %133 {strides = array<i32>} : memref<64x32xf32, #tpu.memory_space<vmem>>, vector<8x32xf32>,
    %c5_i32 = arith.constant 5 : i32
    %c8_i32_35 = arith.constant 8 : i32
    %136 = arith.muli %c5_i32, %c8_i32_35 : i32
    %137 = tpu.assume_multiple %136, 8 : i32
    %138 = arith.index_cast %137 : i32 to index
    %c0_36 = arith.constant 0 : index
    %139 = vector.load %arg8[%138, %c0_36] : memref<64x128xf32, #tpu.memory_space<vmem>>, vector<8x128xf32>
    %cst_37 = arith.constant dense<0.000000e+00> : vector<8x128xf32>
    %140 = tpu.matmul %133, %7, %cst_37 {dimension_numbers = #tpu.dot_dimension_numbers<[1], [0], [0], [1], [0, 0, 1, 1], [], []>} : vector<8x32xf32>, vector<32x128xf32>, vector<8x128xf32> -> vector<8x128xf32>
    %141 = arith.addf %139, %140 : vector<8x128xf32>
    %142 = math.tanh %141 : vector<8x128xf32>
    %143 = arith.negf %141 : vector<8x128xf32>
    %144 = math.exp %143 : vector<8x128xf32>
    %cst_38 = arith.constant 1.000000e+00 : f32
    %145 = vector.broadcast %cst_38 : f32 to vector<8x128xf32>
    %146 = arith.addf %145, %144 : vector<8x128xf32>
    %147 = arith.divf %145, %146 : vector<8x128xf32>
    %148 = arith.select %13, %142, %147 : vector<8x128xi1>, vector<8x128xf32>
    %149 = vector.extract_strided_slice %148 {offsets = [0, 0], sizes = [8, 32], strides = [1, 1]} : vector<8x128xf32> to vector<8x32xf32>
    %150 = vector.extract_strided_slice %148 {offsets = [0, 32], sizes = [8, 32], strides = [1, 1]} : vector<8x128xf32> to vector<8x32xf32>
    %151 = vector.extract_strided_slice %148 {offsets = [0, 64], sizes = [8, 32], strides = [1, 1]} : vector<8x128xf32> to vector<8x32xf32>
    %152 = vector.extract_strided_slice %148 {offsets = [0, 96], sizes = [8, 32], strides = [1, 1]} : vector<8x128xf32> to vector<8x32xf32>
    %153 = arith.mulf %150, %131 : vector<8x32xf32>
    %154 = arith.mulf %149, %151 : vector<8x32xf32>
    %155 = arith.addf %153, %154 : vector<8x32xf32>
    %156 = math.tanh %155 : vector<8x32xf32>
    %157 = arith.mulf %152, %156 : vector<8x32xf32>
    %158 = arith.index_cast %137 : i32 to index
    %c0_39 = arith.constant 0 : index
    %159 = vector.load %arg9[%158, %c0_39] : memref<64x32xf32, #tpu.memory_space<vmem>>, vector<8x32xf32>
    tpu.vector_store %arg9[%158, %c0_39], %157 {strides = array<i32>} : memref<64x32xf32, #tpu.memory_space<vmem>>, vector<8x32xf32>,
    %c6_i32 = arith.constant 6 : i32
    %c8_i32_40 = arith.constant 8 : i32
    %160 = arith.muli %c6_i32, %c8_i32_40 : i32
    %161 = tpu.assume_multiple %160, 8 : i32
    %162 = arith.index_cast %161 : i32 to index
    %c0_41 = arith.constant 0 : index
    %163 = vector.load %arg8[%162, %c0_41] : memref<64x128xf32, #tpu.memory_space<vmem>>, vector<8x128xf32>
    %cst_42 = arith.constant dense<0.000000e+00> : vector<8x128xf32>
    %164 = tpu.matmul %157, %7, %cst_42 {dimension_numbers = #tpu.dot_dimension_numbers<[1], [0], [0], [1], [0, 0, 1, 1], [], []>} : vector<8x32xf32>, vector<32x128xf32>, vector<8x128xf32> -> vector<8x128xf32>
    %165 = arith.addf %163, %164 : vector<8x128xf32>
    %166 = math.tanh %165 : vector<8x128xf32>
    %167 = arith.negf %165 : vector<8x128xf32>
    %168 = math.exp %167 : vector<8x128xf32>
    %cst_43 = arith.constant 1.000000e+00 : f32
    %169 = vector.broadcast %cst_43 : f32 to vector<8x128xf32>
    %170 = arith.addf %169, %168 : vector<8x128xf32>
    %171 = arith.divf %169, %170 : vector<8x128xf32>
    %172 = arith.select %13, %166, %171 : vector<8x128xi1>, vector<8x128xf32>
    %173 = vector.extract_strided_slice %172 {offsets = [0, 0], sizes = [8, 32], strides = [1, 1]} : vector<8x128xf32> to vector<8x32xf32>
    %174 = vector.extract_strided_slice %172 {offsets = [0, 32], sizes = [8, 32], strides = [1, 1]} : vector<8x128xf32> to vector<8x32xf32>
    %175 = vector.extract_strided_slice %172 {offsets = [0, 64], sizes = [8, 32], strides = [1, 1]} : vector<8x128xf32> to vector<8x32xf32>
    %176 = vector.extract_strided_slice %172 {offsets = [0, 96], sizes = [8, 32], strides = [1, 1]} : vector<8x128xf32> to vector<8x32xf32>
    %177 = arith.mulf %174, %155 : vector<8x32xf32>
    %178 = arith.mulf %173, %175 : vector<8x32xf32>
    %179 = arith.addf %177, %178 : vector<8x32xf32>
    %180 = math.tanh %179 : vector<8x32xf32>
    %181 = arith.mulf %176, %180 : vector<8x32xf32>
    %182 = arith.index_cast %161 : i32 to index
    %c0_44 = arith.constant 0 : index
    %183 = vector.load %arg9[%182, %c0_44] : memref<64x32xf32, #tpu.memory_space<vmem>>, vector<8x32xf32>
    tpu.vector_store %arg9[%182, %c0_44], %181 {strides = array<i32>} : memref<64x32xf32, #tpu.memory_space<vmem>>, vector<8x32xf32>,
    %c7_i32 = arith.constant 7 : i32
    %c8_i32_45 = arith.constant 8 : i32
    %184 = arith.muli %c7_i32, %c8_i32_45 : i32
    %185 = tpu.assume_multiple %184, 8 : i32
    %186 = arith.index_cast %185 : i32 to index
    %c0_46 = arith.constant 0 : index
    %187 = vector.load %arg8[%186, %c0_46] : memref<64x128xf32, #tpu.memory_space<vmem>>, vector<8x128xf32>
    %cst_47 = arith.constant dense<0.000000e+00> : vector<8x128xf32>
    %188 = tpu.matmul %181, %7, %cst_47 {dimension_numbers = #tpu.dot_dimension_numbers<[1], [0], [0], [1], [0, 0, 1, 1], [], []>} : vector<8x32xf32>, vector<32x128xf32>, vector<8x128xf32> -> vector<8x128xf32>
    %189 = arith.addf %187, %188 : vector<8x128xf32>
    %190 = math.tanh %189 : vector<8x128xf32>
    %191 = arith.negf %189 : vector<8x128xf32>
    %192 = math.exp %191 : vector<8x128xf32>
    %cst_48 = arith.constant 1.000000e+00 : f32
    %193 = vector.broadcast %cst_48 : f32 to vector<8x128xf32>
    %194 = arith.addf %193, %192 : vector<8x128xf32>
    %195 = arith.divf %193, %194 : vector<8x128xf32>
    %196 = arith.select %13, %190, %195 : vector<8x128xi1>, vector<8x128xf32>
    %197 = vector.extract_strided_slice %196 {offsets = [0, 0], sizes = [8, 32], strides = [1, 1]} : vector<8x128xf32> to vector<8x32xf32>
    %198 = vector.extract_strided_slice %196 {offsets = [0, 32], sizes = [8, 32], strides = [1, 1]} : vector<8x128xf32> to vector<8x32xf32>
    %199 = vector.extract_strided_slice %196 {offsets = [0, 64], sizes = [8, 32], strides = [1, 1]} : vector<8x128xf32> to vector<8x32xf32>
    %200 = vector.extract_strided_slice %196 {offsets = [0, 96], sizes = [8, 32], strides = [1, 1]} : vector<8x128xf32> to vector<8x32xf32>
    %201 = arith.mulf %198, %179 : vector<8x32xf32>
    %202 = arith.mulf %197, %199 : vector<8x32xf32>
    %203 = arith.addf %201, %202 : vector<8x32xf32>
    %204 = math.tanh %203 : vector<8x32xf32>
    %205 = arith.mulf %200, %204 : vector<8x32xf32>
    %206 = arith.index_cast %185 : i32 to index
    %c0_49 = arith.constant 0 : index
    %207 = vector.load %arg9[%206, %c0_49] : memref<64x32xf32, #tpu.memory_space<vmem>>, vector<8x32xf32>
    tpu.vector_store %arg9[%206, %c0_49], %205 {strides = array<i32>} : memref<64x32xf32, #tpu.memory_space<vmem>>, vector<8x32xf32>,
    %c8_i32_50 = arith.constant 8 : i32
    %c0_51 = arith.constant 0 : index
    %c0_52 = arith.constant 0 : index
    %208 = vector.load %arg9[%c0_51, %c0_52] : memref<64x32xf32, #tpu.memory_space<vmem>>, vector<64x32xf32>
    %c0_53 = arith.constant 0 : index
    %c0_54 = arith.constant 0 : index
    %209 = vector.load %arg4[%c0_53, %c0_54] : memref<1x32xf32, #tpu.memory_space<vmem>>, vector<1x32xf32>
    %cst_55 = arith.constant dense<0.000000e+00> : vector<1x64xf32>
    %210 = tpu.matmul %209, %208, %cst_55 {dimension_numbers = #tpu.dot_dimension_numbers<[1], [1], [0], [0], [0, 0, 1, 0], [], []>} : vector<1x32xf32>, vector<64x32xf32>, vector<1x64xf32> -> vector<1x64xf32>
    %c0_56 = arith.constant 0 : index
    %c0_57 = arith.constant 0 : index
    %211 = memref.load %arg5[%c0_56, %c0_57] : memref<1x1xf32, #tpu.memory_space<smem>>
    %212 = vector.broadcast %211 : f32 to vector<1x64xf32>
    %213 = arith.addf %210, %212 : vector<1x64xf32>
    %214 = arith.negf %213 : vector<1x64xf32>
    %215 = math.exp %214 : vector<1x64xf32>
    %cst_58 = arith.constant 1.000000e+00 : f32
    %216 = vector.broadcast %cst_58 : f32 to vector<1x64xf32>
    %217 = arith.addf %216, %215 : vector<1x64xf32>
    %218 = arith.divf %216, %217 : vector<1x64xf32>
    %c0_59 = arith.constant 0 : index
    %c0_60 = arith.constant 0 : index
    %219 = vector.load %arg6[%c0_59, %c0_60] : memref<1x64xf32, #tpu.memory_space<vmem>>, vector<1x64xf32>
    %cst_61 = arith.constant 2.000000e+00 : f32
    %220 = vector.broadcast %cst_61 : f32 to vector<1x64xf32>
    %221 = arith.mulf %220, %218 : vector<1x64xf32>
    %cst_62 = arith.constant 1.000000e+00 : f32
    %222 = vector.broadcast %cst_62 : f32 to vector<1x64xf32>
    %223 = arith.subf %221, %222 : vector<1x64xf32>
    %224 = arith.addf %223, %219 : vector<1x64xf32>
    %cst_63 = arith.constant 1.000000e+00 : f32
    %225 = vector.broadcast %cst_63 : f32 to vector<1x64xf32>
    %226 = arith.divf %224, %225 : vector<1x64xf32>
    %227 = arith.negf %226 : vector<1x64xf32>
    %228 = math.exp %227 : vector<1x64xf32>
    %cst_64 = arith.constant 1.000000e+00 : f32
    %229 = vector.broadcast %cst_64 : f32 to vector<1x64xf32>
    %230 = arith.addf %229, %228 : vector<1x64xf32>
    %231 = arith.divf %229, %230 : vector<1x64xf32>
    %c0_65 = arith.constant 0 : index
    %c0_66 = arith.constant 0 : index
    %232 = vector.load %arg7[%c0_65, %c0_66] : memref<1x64xf32, #tpu.memory_space<vmem>>, vector<1x64xf32>
    tpu.vector_store %arg7[%c0_65, %c0_66], %231 {strides = array<i32>} : memref<1x64xf32, #tpu.memory_space<vmem>>, vector<1x64xf32>,
    return
  }
}

</mosaic_0001>

<bundles_post_ra>
// kernel: tpu_custom_call.1
= control target key start
LH: loop header
LB: loop body
LE: loop exit
PB: predicated region body
PF: predicated region fallthrough
CT: control target
= control target key end

     0   :  { %s1192_s0 = inlined_call_operand.vmem [shape: f32[64,32], index: 0, kind: input, shape index: {}]   ;;  %s1193_s1 = inlined_call_operand.vmem [shape: f32[32,128], index: 1, kind: input, shape index: {}]   ;;  %s1194_s2 = inlined_call_operand.vmem [shape: f32[32,128], index: 2, kind: input, shape index: {}]   ;;  %s1195_s3 = inlined_call_operand.vmem [shape: f32[1,128], index: 3, kind: input, shape index: {}]   ;;  %s1196_s4 = inlined_call_operand.vmem [shape: f32[1,32], index: 4, kind: input, shape index: {}]   ;;  %s1197_s5 = inlined_call_operand.<no memory space> [shape: f32[1,1], index: 5, kind: input, shape index: {}]   ;;  %s1198_s6 = inlined_call_operand.vmem [shape: f32[1,64], index: 6, kind: input, shape index: {}]   ;;  %s1199_s7 = inlined_call_operand.hbm [shape: f32[1,64], index: 7, kind: output, shape index: {}]  }
   0x1   :  { %v39_v0 = vld [vmem:[%s1193_s1 + $0x18] sm:$0xff]  ;;  %v38_v1 = vld [vmem:[%s1193_s1 + $0x10] sm:$0xff]  ;;  %v37_v3 = vld [vmem:[%s1193_s1 + $0x8] sm:$0xff] }
   0x2   :  { %831 = vmatpush.msra.mxu1 %v39_v0  ;;  %81 = vmatpush.msra.mxu0 %v39_v0  ;;  %v995_v2 = vld [vmem:[%s1194_s2 + $0x18] sm:$0xff]  ;;  %v1004_v4 = vld [vmem:[%s1194_s2 + $0x10] sm:$0xff]  ;;  %v36_v5 = vld [vmem:[%s1193_s1] sm:$0xff] }
   0x3   :  { %832 = vmatpush.msra.mxu2 %v39_v0  ;;  %487 = vmatpush.msra.mxu3 %v995_v2 }
   0x4   :  { %833 = vmatpush.msra.mxu1 %v38_v1  ;;  %82 = vmatpush.msra.mxu0 %v38_v1 }
   0x5   :  { %834 = vmatpush.msra.mxu2 %v38_v1  ;;  %488 = vmatpush.msra.mxu3 %v1004_v4 }
   0x6   :  { %13 = vsyncpa [#allocation6], 0  ;;  %835 = vmatpush.msra.mxu1 %v37_v3  ;;  %v33_v6 = vld [vmem:[%s1192_s0 + $0x28] sm:$0xff]  ;;  %vm44_vm0 = vcmask 261120   ;;  %83 = vmatpush.msra.mxu0 %v37_v3  ;;  %v28_v8 = vld [vmem:[%s1192_s0] sm:$0xff]  ;;  %v942_v10 = vmov 0.0   ;;  %v122_v20 = vlaneseq }
   0x7   :  { %v1016_v7 = vld [vmem:[%s1194_s2 + $0x8] sm:$0xff]  ;;  %836 = vmatpush.msra.mxu2 %v37_v3  ;;  %v1028_v9 = vld [vmem:[%s1194_s2] sm:$0xff]  ;;  %s944_s21 = smov 32   ;;  %v34_v41 = vld [vmem:[%s1192_s0 + $0x30] sm:$0xff]  ;;  %s945_s14 = smov [#allocation5]  }
   0x8   :  { %489 = vmatpush.msra.mxu3 %v1016_v7  ;;  %837 = vmatpush.msra.mxu1 %v36_v5  ;;  %v1051_v13 = vld [vmem:[%s1195_s3] ss:$0 sm:$0xff]  ;;  %v123_v22 = vand.u32 127, %v122_v20  ;;  %s943_s3 = smov 64   ;;  %v35_v42 = vld [vmem:[%s1192_s0 + $0x38] sm:$0xff]  ;;  %v29_v45 = vld [vmem:[%s1192_s0 + $0x8] sm:$0xff] }
   0x9   :  { %84 = vmatpush.msra.mxu0 %v36_v5  ;;  %801 = vmatmul.msk.f32.vlgmr.msra.gmra.mxu1 %vm44_vm0, %v33_v6  ;;  %s785_s15 = sshll.u32 %s945_s14, 4  ;;  %s786_s15 = int_to_ptr.vmem [resolvable:$true] %s785_s15 }
   0xa   :  { %796 = vmatmul.msk.f32.vlgmr.msra.gmra.mxu0 %vm44_vm0, %v28_v8  ;;  %143 = vmatpush.msrb.mxu1 %v995_v2  ;;  %vm124_vm1 = vcmp.ge.s32.totalorder %v123_v22, 64  ;;  %vm125_vm2 = vcmp.lt.s32.totalorder %v123_v22, 96 }
   0xb   :  { %838 = vmatpush.msra.mxu2 %v36_v5  ;;  %490 = vmatpush.msra.mxu3 %v1028_v9  ;;  %vm1054_vm4 = vmand %vm124_vm1, %vm125_vm2 }
   0xc   :  { %144 = vmatpush.msrb.mxu1 %v1004_v4  ;;  %802 = vmatmul.msk.f32.vlgmr.msra.gmra.mxu2 %vm44_vm0, %v34_v41 }
   0xd   :  { %211 = vmatpush.msrb.mxu2 %v995_v2 }
   0xe   :  { %145 = vmatpush.msrb.mxu1 %v1016_v7 }
   0xf   :  { %212 = vmatpush.msrb.mxu2 %v1004_v4 }
  0x10   :  { %146 = vmatpush.msrb.mxu1 %v1028_v9 }
  0x11   :  { %213 = vmatpush.msrb.mxu2 %v1016_v7  ;;  %147 = vmatmul.f32.vlgmr.msrb.gmra.mxu1 %v942_v10 }
  0x12   :  { %280 = vmatpush.msra.mxu1 %v995_v2  ;;  %797 = vmatmul.msk.f32.gmra.mxu0 %vm44_vm0, %v29_v45 }
  0x13   :  { %214 = vmatpush.msrb.mxu2 %v1028_v9 }
  0x14   :  { %281 = vmatpush.msra.mxu1 %v1004_v4  ;;  %803 = vmatmul.msk.f32.gmra.mxu2 %vm44_vm0, %v35_v42  ;;  %v31_v42 = vld [vmem:[%s1192_s0 + $0x18] sm:$0xff] }
  0x15   :  { %418 = vmatpush.msra.mxu2 %v995_v2 }
  0x16   :  { %282 = vmatpush.msra.mxu1 %v1016_v7 }
  0x17   :  { %419 = vmatpush.msra.mxu2 %v1004_v4 }
  0x18   :  { %283 = vmatpush.msra.mxu1 %v1028_v9 }
  0x19   :  { %420 = vmatpush.msra.mxu2 %v1016_v7 }
  0x1a   :  { %349 = vmatpush.msrb.mxu1 %v995_v2 }
  0x1b   :  { %421 = vmatpush.msra.mxu2 %v1028_v9 }
  0x1c   :  { %350 = vmatpush.msrb.mxu1 %v1004_v4 }
  0x1e   :  { %351 = vmatpush.msrb.mxu1 %v1016_v7 }
  0x20   :  { %352 = vmatpush.msrb.mxu1 %v1028_v9 }
  0x86   :  { %v1046_v11 = vpop.f32.mrf.mxu1 }
  0x87   :  { %v86_v12 = vpop.f32.mrf.mxu0 }
  0x88   :  { %v87_v14 = vadd.f32 %v1051_v13, %v86_v12 }
  0x8e   :  { %v148_v15 = vpop.f32.mrf.mxu1 }
  0x8f   :  { %v151_v16 = vadd.f32 %v148_v15, %v87_v14  ;;  %v1086_v47 = vpop.f32.mrf.mxu2  ;;  %v89_v49 = vpop.f32.mrf.mxu0 }
  0x90   :  { %v90_v50 = vadd.f32 %v1051_v13, %v89_v49 }
  0x91   :  { %v804_v17 = vmul.f32 -1.442695, %v151_v16 }
  0x93   :  { %844 = vpow2.f32 %v804_v17 }
  0x97   :  { %v1088_v48 = vpop.f32.mrf.mxu2 }
  0x99   :  { %v845_v18 = vpop.eup %844 }
  0x9a   :  { %v156_v19 = vadd.f32 1.0, %v845_v18 }
  0x9c   :  { %846 = vrcp.f32 %v156_v19  ;;  %v168_v25 = vand.u32 2147483648, %v156_v19  ;;  %v166_v27 = vand.u32 2147483647, %v156_v19  ;;  %vm162_vm5 = vweird.f32 %v156_v19 }
  0x9d   :  { %848 = vtanh.f32 %v151_v16  ;;  %v30_v16 = vld [vmem:[%s1192_s0 + $0x10] sm:$0xff] }
  0x9e   :  { %v169_v30 = vor.u32 1.1754944e-38, %v168_v25  ;;  %vm167_vm7 = vcmp.eq.f32.partialorder %v166_v27, 8.507059e+37  ;;  %798 = vmatmul.msk.f32.gmra.mxu0 %vm44_vm0, %v30_v16 }
  0xa2   :  { %v847_v21 = vpop.eup %846 }
  0xa3   :  { %v158_v23 = vmul.f32 %v847_v21, %v156_v19  ;;  %vm163_vm3 = vweird.f32 %v847_v21  ;;  %v849_v32 = vpop.eup %848 }
  0xa4   :  { %vm164_vm6 = vmor %vm162_vm5, %vm163_vm3 }
  0xa5   :  { %v159_v24 = vsub.f32 1.0, %v158_v23 }
  0xa6   :  { %799 = vmatmul.msk.f32.gmra.mxu0 %vm44_vm0, %v31_v42 }
  0xa7   :  { %v160_v26 = vmul.f32 %v847_v21, %v159_v24 }
  0xa9   :  { %v161_v29 = vadd.f32 %v847_v21, %v160_v26 }
  0xab   :  { %v165_v31 = vsel %vm164_vm6, %v847_v21, %v161_v29 }
  0xac   :  { %v170_v33 = vsel %vm167_vm7, %v169_v30, %v165_v31 }
  0xad   :  { %v172_v34 = vsel %vm1054_vm4, %v849_v32, %v170_v33 }
  0xae   :  { %175 = vrot.lane.b32.xlu0 %v172_v34, %s943_s3  ;;  %v173_v37 = vmul.f32 0.0, %v172_v34 }
 0x11b   :  { %v92_v20 = vpop.f32.mrf.mxu0 }
 0x11c   :  { %v93_v21 = vadd.f32 %v1051_v13, %v92_v20 }
 0x120   :  { %v176_v35 = vpop.permute.xlu0 %175 }
 0x121   :  { %v178_v36 = vmul.f32 %v176_v35, %v172_v34 }
 0x123   :  { %180 = vrot.lane.b32.xlu0 %v178_v36, %s944_s21 }
 0x195   :  { %v181_v38 = vpop.permute.xlu0 %180 }
 0x196   :  { %v183_v39 = vadd.f32 %v181_v38, %v173_v37 }
 0x198   :  { %850 = vtanh.f32 %v183_v39 }
 0x19e   :  { %v851_v40 = vpop.eup %850 }
 0x19f   :  { %186 = vrot.lane.b32.xlu1 %v851_v40, %s943_s3 }
 0x211   :  { %v187_v43 = vpop.permute.xlu1 %186 }
 0x212   :  { %v189_v44 = vmul.f32 %v187_v43, %v172_v34 }
 0x214   :  { %191 = vrot.lane.b32.xlu1 %v189_v44, %s944_s21 }
 0x286   :  { %v192_v46 = vpop.permute.xlu1 %191 }
 0x287   :  { %194 = vst.msk [vmem:[#allocation3] sm:$0xff] %vm44_vm0, %v192_v46  ;;  %805 = vmatmul.msk.f32.vlgmr.msrb.gmra.mxu2 %vm44_vm0, %v192_v46  ;;  %v95_v46 = vpop.f32.mrf.mxu0 }
 0x288   :  { %625 = vmatpush.msrb.mxu2 %v995_v2  ;;  %v96_v49 = vadd.f32 %v1051_v13, %v95_v46 }
 0x28a   :  { %626 = vmatpush.msrb.mxu2 %v1004_v4 }
 0x28c   :  { %627 = vmatpush.msrb.mxu2 %v1016_v7 }
 0x28e   :  { %628 = vmatpush.msrb.mxu2 %v1028_v9 }
 0x30a   :  { %v216_v51 = vpop.f32.mrf.mxu2 }
 0x30b   :  { %v219_v52 = vadd.f32 %v216_v51, %v90_v50 }
 0x30d   :  { %v806_v53 = vmul.f32 -1.442695, %v219_v52 }
 0x30f   :  { %852 = vpow2.f32 %v806_v53 }
 0x315   :  { %v853_v54 = vpop.eup %852 }
 0x316   :  { %v224_v55 = vadd.f32 1.0, %v853_v54 }
 0x318   :  { %854 = vrcp.f32 %v224_v55  ;;  %v236_v59 = vand.u32 2147483648, %v224_v55  ;;  %v234_v61 = vand.u32 2147483647, %v224_v55  ;;  %vm230_vm9 = vweird.f32 %v224_v55 }
 0x319   :  { %856 = vtanh.f32 %v219_v52 }
 0x31a   :  { %v237_v63 = vor.u32 1.1754944e-38, %v236_v59  ;;  %vm235_vm11 = vcmp.eq.f32.partialorder %v234_v61, 8.507059e+37 }
 0x31e   :  { %v855_v56 = vpop.eup %854 }
 0x31f   :  { %v226_v57 = vmul.f32 %v855_v56, %v224_v55  ;;  %vm231_vm8 = vweird.f32 %v855_v56  ;;  %v857_v1 = vpop.eup %856 }
 0x320   :  { %vm232_vm10 = vmor %vm230_vm9, %vm231_vm8 }
 0x321   :  { %v227_v58 = vsub.f32 1.0, %v226_v57 }
 0x323   :  { %v228_v60 = vmul.f32 %v855_v56, %v227_v58 }
 0x325   :  { %v229_v62 = vadd.f32 %v855_v56, %v228_v60 }
 0x327   :  { %v233_v0 = vsel %vm232_vm10, %v855_v56, %v229_v62 }
 0x328   :  { %v238_v3 = vsel %vm235_vm11, %v237_v63, %v233_v0 }
 0x329   :  { %v240_v5 = vsel %vm1054_vm4, %v857_v1, %v238_v3 }
 0x32a   :  { %243 = vrot.lane.b32.xlu2 %v240_v5, %s943_s3  ;;  %v241_v10 = vmul.f32 %v240_v5, %v183_v39 }
 0x384   :  { %v244_v6 = vpop.permute.xlu2 %243 }
 0x385   :  { %v246_v8 = vmul.f32 %v244_v6, %v240_v5 }
 0x387   :  { %248 = vrot.lane.b32.xlu2 %v246_v8, %s944_s21 }
 0x3e1   :  { %v249_v12 = vpop.permute.xlu2 %248 }
 0x3e2   :  { %v251_v14 = vadd.f32 %v249_v12, %v241_v10 }
 0x3e4   :  { %858 = vtanh.f32 %v251_v14 }
 0x3ea   :  { %v859_v15 = vpop.eup %858 }
 0x3eb   :  { %254 = vrot.lane.b32.xlu0 %v859_v15, %s943_s3 }
 0x45d   :  { %v255_v17 = vpop.permute.xlu0 %254 }
 0x45e   :  { %v257_v18 = vmul.f32 %v255_v17, %v240_v5  ;;  %v32_v17 = vld [vmem:[%s1192_s0 + $0x20] sm:$0xff] }
 0x45f   :  { %800 = vmatmul.msk.f32.gmra.mxu0 %vm44_vm0, %v32_v17 }
 0x460   :  { %259 = vrot.lane.b32.xlu1 %v257_v18, %s944_s21 }
 0x4d2   :  { %v260_v19 = vpop.permute.xlu1 %259 }
 0x4d3   :  { %263 = vst.msk [vmem:[#allocation3 + $0x8] sm:$0xff] %vm44_vm0, %v260_v19  ;;  %807 = vmatmul.msk.f32.vlgmr.msra.gmra.mxu1 %vm44_vm0, %v260_v19 }
 0x4d4   :  { %556 = vmatpush.msra.mxu1 %v995_v2 }
 0x4d6   :  { %557 = vmatpush.msra.mxu1 %v1004_v4 }
 0x4d8   :  { %558 = vmatpush.msra.mxu1 %v1016_v7 }
 0x4da   :  { %559 = vmatpush.msra.mxu1 %v1028_v9 }
 0x4dc   :  { %v98_v19 = vpop.f32.mrf.mxu0 }
 0x4dd   :  { %v99_v20 = vadd.f32 %v1051_v13, %v98_v19 }
 0x550   :  { %v285_v22 = vpop.f32.mrf.mxu1 }
 0x551   :  { %v288_v23 = vadd.f32 %v285_v22, %v93_v21 }
 0x553   :  { %v808_v24 = vmul.f32 -1.442695, %v288_v23 }
 0x555   :  { %860 = vpow2.f32 %v808_v24 }
 0x55b   :  { %v861_v25 = vpop.eup %860 }
 0x55c   :  { %v293_v26 = vadd.f32 1.0, %v861_v25 }
 0x55e   :  { %862 = vrcp.f32 %v293_v26  ;;  %v305_v2 = vand.u32 2147483648, %v293_v26  ;;  %v303_v7 = vand.u32 2147483647, %v293_v26  ;;  %vm299_vm13 = vweird.f32 %v293_v26 }
 0x55f   :  { %864 = vtanh.f32 %v288_v23 }
 0x560   :  { %v306_v9 = vor.u32 1.1754944e-38, %v305_v2  ;;  %vm304_vm15 = vcmp.eq.f32.partialorder %v303_v7, 8.507059e+37 }
 0x564   :  { %v863_v27 = vpop.eup %862 }
 0x565   :  { %v295_v29 = vmul.f32 %v863_v27, %v293_v26  ;;  %vm300_vm12 = vweird.f32 %v863_v27  ;;  %v865_v33 = vpop.eup %864 }
 0x566   :  { %vm301_vm14 = vmor %vm299_vm13, %vm300_vm12 }
 0x567   :  { %v296_v30 = vsub.f32 1.0, %v295_v29 }
 0x569   :  { %v297_v4 = vmul.f32 %v863_v27, %v296_v30 }
 0x56b   :  { %v298_v31 = vadd.f32 %v863_v27, %v297_v4 }
 0x56d   :  { %v302_v32 = vsel %vm301_vm14, %v863_v27, %v298_v31 }
 0x56e   :  { %v307_v34 = vsel %vm304_vm15, %v306_v9, %v302_v32 }
 0x56f   :  { %v309_v35 = vsel %vm1054_vm4, %v865_v33, %v307_v34 }
 0x570   :  { %312 = vrot.lane.b32.xlu2 %v309_v35, %s943_s3  ;;  %v310_v38 = vmul.f32 %v309_v35, %v251_v14 }
 0x5ca   :  { %v313_v36 = vpop.permute.xlu2 %312 }
 0x5cb   :  { %v315_v37 = vmul.f32 %v313_v36, %v309_v35 }
 0x5cd   :  { %317 = vrot.lane.b32.xlu0 %v315_v37, %s944_s21 }
 0x63f   :  { %v318_v39 = vpop.permute.xlu0 %317 }
 0x640   :  { %v320_v40 = vadd.f32 %v318_v39, %v310_v38 }
 0x642   :  { %866 = vtanh.f32 %v320_v40 }
 0x648   :  { %v867_v41 = vpop.eup %866 }
 0x649   :  { %323 = vrot.lane.b32.xlu1 %v867_v41, %s943_s3 }
 0x6bb   :  { %v324_v43 = vpop.permute.xlu1 %323 }
 0x6bc   :  { %v326_v44 = vmul.f32 %v324_v43, %v309_v35 }
 0x6be   :  { %328 = vrot.lane.b32.xlu2 %v326_v44, %s944_s21  ;;  %v102_v44 = vadd.f32 %v1051_v13, %v1046_v11 }
 0x718   :  { %v329_v45 = vpop.permute.xlu2 %328 }
 0x719   :  { %332 = vst.msk [vmem:[#allocation3 + $0x10] sm:$0xff] %vm44_vm0, %v329_v45  ;;  %809 = vmatmul.msk.f32.vlgmr.msrb.gmra.mxu1 %vm44_vm0, %v329_v45 }
 0x796   :  { %v354_v50 = vpop.f32.mrf.mxu1 }
 0x797   :  { %v357_v51 = vadd.f32 %v354_v50, %v96_v49 }
 0x799   :  { %v810_v52 = vmul.f32 -1.442695, %v357_v51 }
 0x79b   :  { %868 = vpow2.f32 %v810_v52 }
 0x7a1   :  { %v869_v53 = vpop.eup %868 }
 0x7a2   :  { %v362_v54 = vadd.f32 1.0, %v869_v53 }
 0x7a4   :  { %870 = vrcp.f32 %v362_v54  ;;  %v374_v58 = vand.u32 2147483648, %v362_v54  ;;  %v372_v60 = vand.u32 2147483647, %v362_v54  ;;  %vm368_vm2 = vweird.f32 %v362_v54 }
 0x7a5   :  { %872 = vtanh.f32 %v357_v51 }
 0x7a6   :  { %v375_v62 = vor.u32 1.1754944e-38, %v374_v58  ;;  %vm373_vm5 = vcmp.eq.f32.partialorder %v372_v60, 8.507059e+37 }
 0x7aa   :  { %v871_v55 = vpop.eup %870 }
 0x7ab   :  { %v364_v56 = vmul.f32 %v871_v55, %v362_v54  ;;  %vm369_vm1 = vweird.f32 %v871_v55  ;;  %v873_v0 = vpop.eup %872 }
 0x7ac   :  { %vm370_vm3 = vmor %vm368_vm2, %vm369_vm1 }
 0x7ad   :  { %v365_v57 = vsub.f32 1.0, %v364_v56 }
 0x7af   :  { %v366_v59 = vmul.f32 %v871_v55, %v365_v57 }
 0x7b1   :  { %v367_v61 = vadd.f32 %v871_v55, %v366_v59 }
 0x7b3   :  { %v371_v63 = vsel %vm370_vm3, %v871_v55, %v367_v61 }
 0x7b4   :  { %v376_v1 = vsel %vm373_vm5, %v375_v62, %v371_v63 }
 0x7b5   :  { %v378_v3 = vsel %vm1054_vm4, %v873_v0, %v376_v1 }
 0x7b6   :  { %381 = vrot.lane.b32.xlu0 %v378_v3, %s943_s3  ;;  %v379_v8 = vmul.f32 %v378_v3, %v320_v40 }
 0x828   :  { %v382_v5 = vpop.permute.xlu0 %381 }
 0x829   :  { %v384_v6 = vmul.f32 %v382_v5, %v378_v3 }
 0x82b   :  { %386 = vrot.lane.b32.xlu1 %v384_v6, %s944_s21 }
 0x89d   :  { %v387_v10 = vpop.permute.xlu1 %386 }
 0x89e   :  { %v389_v12 = vadd.f32 %v387_v10, %v379_v8 }
 0x8a0   :  { %874 = vtanh.f32 %v389_v12 }
 0x8a6   :  { %v875_v14 = vpop.eup %874 }
 0x8a7   :  { %392 = vrot.lane.b32.xlu2 %v875_v14, %s943_s3  ;;  %v105_v14 = vadd.f32 %v1051_v13, %v1086_v47 }
 0x901   :  { %v393_v15 = vpop.permute.xlu2 %392 }
 0x902   :  { %v395_v16 = vmul.f32 %v393_v15, %v378_v3 }
 0x904   :  { %397 = vrot.lane.b32.xlu0 %v395_v16, %s944_s21 }
 0x976   :  { %v398_v18 = vpop.permute.xlu0 %397 }
 0x977   :  { %401 = vst.msk [vmem:[#allocation3 + $0x18] sm:$0xff] %vm44_vm0, %v398_v18  ;;  %811 = vmatmul.msk.f32.vlgmr.msra.gmra.mxu2 %vm44_vm0, %v398_v18 }
 0x9fa   :  { %v423_v21 = vpop.f32.mrf.mxu2 }
 0x9fb   :  { %v426_v22 = vadd.f32 %v423_v21, %v99_v20 }
 0x9fd   :  { %v812_v23 = vmul.f32 -1.442695, %v426_v22 }
 0x9ff   :  { %876 = vpow2.f32 %v812_v23 }
 0xa05   :  { %v877_v24 = vpop.eup %876 }
 0xa06   :  { %v431_v25 = vadd.f32 1.0, %v877_v24 }
 0xa08   :  { %878 = vrcp.f32 %v431_v25  ;;  %v443_v30 = vand.u32 2147483648, %v431_v25  ;;  %v441_v4 = vand.u32 2147483647, %v431_v25  ;;  %vm437_vm7 = vweird.f32 %v431_v25 }
 0xa09   :  { %880 = vtanh.f32 %v426_v22 }
 0xa0a   :  { %v444_v31 = vor.u32 1.1754944e-38, %v443_v30  ;;  %vm442_vm9 = vcmp.eq.f32.partialorder %v441_v4, 8.507059e+37 }
 0xa0e   :  { %v879_v26 = vpop.eup %878 }
 0xa0f   :  { %v433_v27 = vmul.f32 %v879_v26, %v431_v25  ;;  %vm438_vm6 = vweird.f32 %v879_v26  ;;  %v881_v32 = vpop.eup %880 }
 0xa10   :  { %vm439_vm8 = vmor %vm437_vm7, %vm438_vm6 }
 0xa11   :  { %v434_v29 = vsub.f32 1.0, %v433_v27 }
 0xa13   :  { %v435_v2 = vmul.f32 %v879_v26, %v434_v29 }
 0xa15   :  { %v436_v7 = vadd.f32 %v879_v26, %v435_v2 }
 0xa17   :  { %v440_v9 = vsel %vm439_vm8, %v879_v26, %v436_v7 }
 0xa18   :  { %v445_v33 = vsel %vm442_vm9, %v444_v31, %v440_v9 }
 0xa19   :  { %v447_v34 = vsel %vm1054_vm4, %v881_v32, %v445_v33 }
 0xa1a   :  { %450 = vrot.lane.b32.xlu1 %v447_v34, %s943_s3  ;;  %v448_v37 = vmul.f32 %v447_v34, %v389_v12 }
 0xa8c   :  { %v451_v35 = vpop.permute.xlu1 %450 }
 0xa8d   :  { %v453_v36 = vmul.f32 %v451_v35, %v447_v34 }
 0xa8f   :  { %455 = vrot.lane.b32.xlu2 %v453_v36, %s944_s21 }
 0xae9   :  { %v456_v38 = vpop.permute.xlu2 %455 }
 0xaea   :  { %v458_v39 = vadd.f32 %v456_v38, %v448_v37  ;;  %v108_v37 = vadd.f32 %v1051_v13, %v1088_v48 }
 0xaec   :  { %882 = vtanh.f32 %v458_v39 }
 0xaf2   :  { %v883_v40 = vpop.eup %882 }
 0xaf3   :  { %461 = vrot.lane.b32.xlu0 %v883_v40, %s943_s3 }
 0xb65   :  { %v462_v41 = vpop.permute.xlu0 %461 }
 0xb66   :  { %v464_v42 = vmul.f32 %v462_v41, %v447_v34 }
 0xb68   :  { %466 = vrot.lane.b32.xlu1 %v464_v42, %s944_s21 }
 0xbda   :  { %v467_v43 = vpop.permute.xlu1 %466 }
 0xbdb   :  { %470 = vst.msk [vmem:[#allocation3 + $0x20] sm:$0xff] %vm44_vm0, %v467_v43  ;;  %813 = vmatmul.msk.f32.vlgmr.msra.gmra.mxu3 %vm44_vm0, %v467_v43 }
 0xc5e   :  { %v492_v45 = vpop.f32.mrf.mxu3 }
 0xc5f   :  { %v495_v46 = vadd.f32 %v492_v45, %v102_v44 }
 0xc61   :  { %v814_v49 = vmul.f32 -1.442695, %v495_v46 }
 0xc63   :  { %884 = vpow2.f32 %v814_v49 }
 0xc69   :  { %v885_v50 = vpop.eup %884 }
 0xc6a   :  { %v500_v51 = vadd.f32 1.0, %v885_v50 }
 0xc6c   :  { %886 = vrcp.f32 %v500_v51  ;;  %v512_v55 = vand.u32 2147483648, %v500_v51  ;;  %v510_v57 = vand.u32 2147483647, %v500_v51  ;;  %vm506_vm11 = vweird.f32 %v500_v51 }
 0xc6d   :  { %888 = vtanh.f32 %v495_v46 }
 0xc6e   :  { %v513_v59 = vor.u32 1.1754944e-38, %v512_v55  ;;  %vm511_vm13 = vcmp.eq.f32.partialorder %v510_v57, 8.507059e+37 }
 0xc72   :  { %v887_v52 = vpop.eup %886 }
 0xc73   :  { %v502_v53 = vmul.f32 %v887_v52, %v500_v51  ;;  %vm507_vm10 = vweird.f32 %v887_v52  ;;  %v889_v60 = vpop.eup %888 }
 0xc74   :  { %vm508_vm12 = vmor %vm506_vm11, %vm507_vm10 }
 0xc75   :  { %v503_v54 = vsub.f32 1.0, %v502_v53 }
 0xc77   :  { %v504_v56 = vmul.f32 %v887_v52, %v503_v54 }
 0xc79   :  { %v505_v58 = vadd.f32 %v887_v52, %v504_v56 }
 0xc7b   :  { %v509_v11 = vsel %vm508_vm12, %v887_v52, %v505_v58 }
 0xc7c   :  { %v514_v61 = vsel %vm511_vm13, %v513_v59, %v509_v11  ;;  %vm778_vm13 = vcmask 516096  }
 0xc7d   :  { %v516_v62 = vsel %vm1054_vm4, %v889_v60, %v514_v61 }
 0xc7e   :  { %519 = vrot.lane.b32.xlu2 %v516_v62, %s943_s3  ;;  %v517_v1 = vmul.f32 %v516_v62, %v458_v39 }
 0xcd8   :  { %v520_v63 = vpop.permute.xlu2 %519 }
 0xcd9   :  { %v522_v0 = vmul.f32 %v520_v63, %v516_v62 }
 0xcdb   :  { %524 = vrot.lane.b32.xlu0 %v522_v0, %s944_s21 }
 0xd4d   :  { %v525_v3 = vpop.permute.xlu0 %524 }
 0xd4e   :  { %v527_v5 = vadd.f32 %v525_v3, %v517_v1  ;;  %v682_v1 = vld [vmem:[#allocation3 + $0x20] sm:$0xff]  ;;  %v681_v3 = vld [vmem:[#allocation3 + $0x18] sm:$0xff] }
 0xd50   :  { %890 = vtanh.f32 %v527_v5 }
 0xd56   :  { %v891_v6 = vpop.eup %890 }
 0xd57   :  { %530 = vrot.lane.b32.xlu1 %v891_v6, %s943_s3  ;;  %v679_v6 = vld [vmem:[#allocation3 + $0x8] sm:$0xff] }
 0xdc9   :  { %v531_v8 = vpop.permute.xlu1 %530 }
 0xdca   :  { %v533_v10 = vmul.f32 %v531_v8, %v516_v62  ;;  %v678_v8 = vld [vmem:[#allocation3] sm:$0xff] }
 0xdcc   :  { %535 = vrot.lane.b32.xlu2 %v533_v10, %s944_s21  ;;  %v686_v10 = vld [vmem:[%s1196_s4] sm:$0x1] }
 0xe26   :  { %v536_v12 = vpop.permute.xlu2 %535 }
 0xe27   :  { %539 = vst.msk [vmem:[#allocation3 + $0x28] sm:$0xff] %vm44_vm0, %v536_v12  ;;  %815 = vmatmul.msk.f32.vlgmr.msra.gmra.mxu1 %vm44_vm0, %v536_v12  ;;  %v688_v12 = vstv %s1197_s5 }
 0xe2e   :  { %v683_v0 = vld [vmem:[#allocation3 + $0x28] sm:$0xff] }
 0xea4   :  { %v561_v15 = vpop.f32.mrf.mxu1 }
 0xea5   :  { %v564_v16 = vadd.f32 %v561_v15, %v105_v14 }
 0xea7   :  { %v816_v17 = vmul.f32 -1.442695, %v564_v16 }
 0xea9   :  { %892 = vpow2.f32 %v816_v17 }
 0xeaf   :  { %v893_v18 = vpop.eup %892 }
 0xeb0   :  { %v569_v19 = vadd.f32 1.0, %v893_v18 }
 0xeb2   :  { %894 = vrcp.f32 %v569_v19  ;;  %v581_v23 = vand.u32 2147483648, %v569_v19  ;;  %v579_v25 = vand.u32 2147483647, %v569_v19  ;;  %vm575_vm15 = vweird.f32 %v569_v19 }
 0xeb3   :  { %896 = vtanh.f32 %v564_v16 }
 0xeb4   :  { %v582_v27 = vor.u32 1.1754944e-38, %v581_v23  ;;  %vm580_vm2 = vcmp.eq.f32.partialorder %v579_v25, 8.507059e+37 }
 0xeb8   :  { %v895_v20 = vpop.eup %894 }
 0xeb9   :  { %v571_v21 = vmul.f32 %v895_v20, %v569_v19  ;;  %vm576_vm14 = vweird.f32 %v895_v20  ;;  %v897_v29 = vpop.eup %896 }
 0xeba   :  { %vm577_vm1 = vmor %vm575_vm15, %vm576_vm14 }
 0xebb   :  { %v572_v22 = vsub.f32 1.0, %v571_v21 }
 0xebd   :  { %v573_v24 = vmul.f32 %v895_v20, %v572_v22 }
 0xebf   :  { %v574_v26 = vadd.f32 %v895_v20, %v573_v24 }
 0xec1   :  { %v578_v47 = vsel %vm577_vm1, %v895_v20, %v574_v26 }
 0xec2   :  { %v583_v30 = vsel %vm580_vm2, %v582_v27, %v578_v47 }
 0xec3   :  { %v585_v2 = vsel %vm1054_vm4, %v897_v29, %v583_v30  ;;  %v755_v30 = vld [vmem:[%s1198_s6] sm:$0x1]  ;;  %s787_s6 = sshll.u32 %s1199_s7, 4  ;;  %s788_s6 = int_to_ptr.hbm [resolvable:$true] %s787_s6 }
 0xec4   :  { %588 = vrot.lane.b32.xlu0 %v585_v2, %s943_s3  ;;  %v586_v31 = vmul.f32 %v585_v2, %v527_v5  ;;  %v680_v5 = vld [vmem:[#allocation3 + $0x10] sm:$0xff] }
 0xf36   :  { %v589_v4 = vpop.permute.xlu0 %588 }
 0xf37   :  { %v591_v7 = vmul.f32 %v589_v4, %v585_v2 }
 0xf39   :  { %593 = vrot.lane.b32.xlu1 %v591_v7, %s944_s21 }
 0xfab   :  { %v594_v9 = vpop.permute.xlu1 %593 }
 0xfac   :  { %v596_v32 = vadd.f32 %v594_v9, %v586_v31 }
 0xfae   :  { %898 = vtanh.f32 %v596_v32 }
 0xfb4   :  { %v899_v33 = vpop.eup %898 }
 0xfb5   :  { %599 = vrot.lane.b32.xlu2 %v899_v33, %s943_s3 }
0x100f   :  { %v600_v34 = vpop.permute.xlu2 %599 }
0x1010   :  { %v602_v35 = vmul.f32 %v600_v34, %v585_v2 }
0x1012   :  { %604 = vrot.lane.b32.xlu0 %v602_v35, %s944_s21 }
0x1084   :  { %v605_v36 = vpop.permute.xlu0 %604 }
0x1085   :  { %608 = vst.msk [vmem:[#allocation3 + $0x30] sm:$0xff] %vm44_vm0, %v605_v36  ;;  %817 = vmatmul.msk.f32.vlgmr.msrb.gmra.mxu2 %vm44_vm0, %v605_v36 }
0x108c   :  { %v684_v63 = vld [vmem:[#allocation3 + $0x30] sm:$0xff] }
0x1108   :  { %v630_v38 = vpop.f32.mrf.mxu2 }
0x1109   :  { %v633_v39 = vadd.f32 %v630_v38, %v108_v37 }
0x110b   :  { %v818_v40 = vmul.f32 -1.442695, %v633_v39 }
0x110d   :  { %900 = vpow2.f32 %v818_v40 }
0x1113   :  { %v901_v41 = vpop.eup %900 }
0x1114   :  { %v638_v42 = vadd.f32 1.0, %v901_v41 }
0x1116   :  { %902 = vrcp.f32 %v638_v42  ;;  %v650_v46 = vand.u32 2147483648, %v638_v42  ;;  %v648_v50 = vand.u32 2147483647, %v638_v42  ;;  %vm644_vm5 = vweird.f32 %v638_v42 }
0x1117   :  { %904 = vtanh.f32 %v633_v39 }
0x1118   :  { %v651_v52 = vor.u32 1.1754944e-38, %v650_v46  ;;  %vm649_vm7 = vcmp.eq.f32.partialorder %v648_v50, 8.507059e+37 }
0x111c   :  { %v903_v43 = vpop.eup %902 }
0x111d   :  { %v640_v44 = vmul.f32 %v903_v43, %v638_v42  ;;  %vm645_vm3 = vweird.f32 %v903_v43  ;;  %v905_v48 = vpop.eup %904 }
0x111e   :  { %vm646_vm6 = vmor %vm644_vm5, %vm645_vm3 }
0x111f   :  { %v641_v45 = vsub.f32 1.0, %v640_v44 }
0x1121   :  { %v642_v49 = vmul.f32 %v903_v43, %v641_v45 }
0x1123   :  { %v643_v51 = vadd.f32 %v903_v43, %v642_v49 }
0x1125   :  { %v647_v13 = vsel %vm646_vm6, %v903_v43, %v643_v51 }
0x1126   :  { %v652_v53 = vsel %vm649_vm7, %v651_v52, %v647_v13 }
0x1127   :  { %v654_v54 = vsel %vm1054_vm4, %v905_v48, %v652_v53 }
0x1128   :  { %657 = vrot.lane.b32.xlu1 %v654_v54, %s943_s3  ;;  %v655_v57 = vmul.f32 %v654_v54, %v596_v32 }
0x119a   :  { %v658_v55 = vpop.permute.xlu1 %657 }
0x119b   :  { %v660_v56 = vmul.f32 %v658_v55, %v654_v54 }
0x119d   :  { %662 = vrot.lane.b32.xlu2 %v660_v56, %s944_s21 }
0x11f7   :  { %v663_v58 = vpop.permute.xlu2 %662 }
0x11f8   :  { %v665_v59 = vadd.f32 %v663_v58, %v655_v57 }
0x11fa   :  { %906 = vtanh.f32 %v665_v59 }
0x1200   :  { %v907_v11 = vpop.eup %906 }
0x1201   :  { %668 = vrot.lane.b32.xlu0 %v907_v11, %s943_s3 }
0x1273   :  { %v669_v60 = vpop.permute.xlu0 %668 }
0x1274   :  { %v671_v61 = vmul.f32 %v669_v60, %v654_v54 }
0x1276   :  { %673 = vrot.lane.b32.xlu1 %v671_v61, %s944_s21 }
0x12e8   :  { %v674_v62 = vpop.permute.xlu1 %673 }
0x12e9   :  { %677 = vst.msk [vmem:[#allocation3 + $0x38] sm:$0xff] %vm44_vm0, %v674_v62 }
0x12f0   :  { %v685_v28 = vld [vmem:[#allocation3 + $0x38] sm:$0xff] }
0x12f1   :  { %819 = vmatpush.xpose.msk.msrb.mxu3 %vm44_vm0, %v685_v28 }
0x12f5   :  { %820 = vmatpush.xpose.msk.msrb.mxu3 %vm44_vm0, %v684_v63 }
0x12f9   :  { %821 = vmatpush.xpose.msk.msrb.mxu3 %vm44_vm0, %v683_v0 }
0x12fd   :  { %822 = vmatpush.xpose.msk.msrb.mxu3 %vm44_vm0, %v682_v1 }
0x1301   :  { %823 = vmatpush.xpose.msk.msrb.mxu3 %vm44_vm0, %v681_v3 }
0x1305   :  { %824 = vmatpush.xpose.msk.msrb.mxu3 %vm44_vm0, %v680_v5 }
0x1309   :  { %825 = vmatpush.xpose.msk.msrb.mxu3 %vm44_vm0, %v679_v6 }
0x130d   :  { %826 = vmatpush.xpose.msk.msrb.mxu3 %vm44_vm0, %v678_v8 }
0x1310   :  { %827 = vmatmul.msk.f32.vlgmr.msrb.gmra.mxu3 %vm44_vm0, %v686_v10 }
0x1393   :  { %v733_v14 = vpop.f32.mrf.mxu3 }
0x1394   :  { %v734_v15 = vadd.f32 %v733_v14, %v688_v12 }
0x1396   :  { %v828_v16 = vmul.f32 -1.442695, %v734_v15 }
0x1398   :  { %908 = vpow2.f32 %v828_v16 }
0x139e   :  { %v909_v17 = vpop.eup %908 }
0x139f   :  { %v739_v18 = vadd.f32 1.0, %v909_v17 }
0x13a1   :  { %910 = vrcp.f32 %v739_v18  ;;  %v751_v22 = vand.u32 2147483648, %v739_v18  ;;  %v749_v24 = vand.u32 2147483647, %v739_v18  ;;  %vm745_vm0 = vweird.f32 %v739_v18 }
0x13a3   :  { %v752_v26 = vor.u32 1.1754944e-38, %v751_v22  ;;  %vm750_vm9 = vcmp.eq.f32.partialorder %v749_v24, 8.507059e+37 }
0x13a7   :  { %v911_v19 = vpop.eup %910 }
0x13a8   :  { %v741_v20 = vmul.f32 %v911_v19, %v739_v18  ;;  %vm746_vm4 = vweird.f32 %v911_v19 }
0x13a9   :  { %vm747_vm8 = vmor %vm745_vm0, %vm746_vm4 }
0x13aa   :  { %v742_v21 = vsub.f32 1.0, %v741_v20 }
0x13ac   :  { %v743_v23 = vmul.f32 %v911_v19, %v742_v21 }
0x13ae   :  { %v744_v25 = vadd.f32 %v911_v19, %v743_v23 }
0x13b0   :  { %v748_v27 = vsel %vm747_vm8, %v911_v19, %v744_v25 }
0x13b1   :  { %v753_v47 = vsel %vm750_vm9, %v752_v26, %v748_v27 }
0x13b2   :  { %v756_v29 = vmul.f32 2.0, %v753_v47 }
0x13b4   :  { %v829_v2 = vadd.f32 -1.0, %v756_v29 }
0x13b6   :  { %v758_v4 = vadd.f32 %v829_v2, %v755_v30 }
0x13b8   :  { %v830_v7 = vmul.f32 -1.442695, %v758_v4 }
0x13ba   :  { %912 = vpow2.f32 %v830_v7 }
0x13c0   :  { %v913_v31 = vpop.eup %912 }
0x13c1   :  { %v762_v9 = vadd.f32 1.0, %v913_v31 }
0x13c3   :  { %914 = vrcp.f32 %v762_v9  ;;  %v774_v35 = vand.u32 2147483648, %v762_v9  ;;  %v772_v37 = vand.u32 2147483647, %v762_v9  ;;  %vm768_vm11 = vweird.f32 %v762_v9 }
0x13c5   :  { %v775_v39 = vor.u32 1.1754944e-38, %v774_v35  ;;  %vm773_vm14 = vcmp.eq.f32.partialorder %v772_v37, 8.507059e+37 }
0x13c9   :  { %v915_v32 = vpop.eup %914 }
0x13ca   :  { %v764_v33 = vmul.f32 %v915_v32, %v762_v9  ;;  %vm769_vm10 = vweird.f32 %v915_v32 }
0x13cb   :  { %vm770_vm12 = vmor %vm768_vm11, %vm769_vm10 }
0x13cc   :  { %v765_v34 = vsub.f32 1.0, %v764_v33 }
0x13ce   :  { %v766_v36 = vmul.f32 %v915_v32, %v765_v34 }
0x13d0   :  { %v767_v38 = vadd.f32 %v915_v32, %v766_v36 }
0x13d2   :  { %v771_v40 = vsel %vm770_vm12, %v915_v32, %v767_v38 }
0x13d3   :  { %v776_v41 = vsel %vm773_vm14, %v775_v39, %v771_v40 }
0x13d4   :  { %779 = vst.msk [vmem:[#allocation5] sm:$0x1] %vm778_vm13, %v776_v41 }
0x13d5   :  { %790 = dma.vmem_to_hbm [thread:$0]  %s786_s15, 16, %s788_s6, [#allocation6]  }
0x13d6   :  { %940 = dma.done.wait [#allocation6], 16  }
0x13d7   :  { %941 = vsyncadd [#allocation6], 4294967280 }
0x13d8   :  { %795 = vsyncpa [#allocation6], 1 }

</bundles_post_ra>
